<compile_context>
chip_gen: v6e
topology: v6e:2x2x1
jax: 0.10.0
libtpu: 0.0.40
codegen_flags: <defaults>
</compile_context>

<pallas_src>
import functools

import jax
import jax.numpy as jnp
from jax.experimental import pallas as pl
from jax.experimental.pallas import tpu as pltpu

BN_EPS = 1e-5
_LANE = 128
_SUBLANE = 8
_STATS_ROWS = _SUBLANE          # stats block rows (row 0 = sum, row 1 = sumsq)


def _round_up(v, m):
    return ((v + m - 1) // m) * m


def _cdiv(a, b):
    return -(-a // b)


_VMEM_LIMIT_CACHE = []


def _vmem_limit_bytes():
    """Scoped-VMEM limit derived from the chip's physical VMEM (cached)."""
    if not _VMEM_LIMIT_CACHE:
        try:
            phys = int(getattr(pltpu.get_tpu_info(), "vmem_capacity_bytes", 0))
        except Exception:
            phys = 0
        if phys <= 0:
            phys = 64 * 1024 * 1024            # conservative fallback (v7x per-TC)
        # ~64 MiB scoped on 128-MiB chips (v5e/v6e), ~45 MiB on 64-MiB (v7x).
        _VMEM_LIMIT_CACHE.append(min(int(phys * 0.7), 64 * 1024 * 1024))
    return _VMEM_LIMIT_CACHE[0]


def _pick_tile_m(m, c_in_p, c_out_p, mm_bytes, o_bytes, vmem_budget, sub_mult):
    """Rows per M tile sized so (dbl-buffered x/out tiles + dbl-buffered weight
    block + f32 matmul intermediate + stats) fit the scoped-VMEM budget."""
    # Fixed cost (independent of tile_m): double-buffered weight + stats/bn blocks.
    fixed = 2 * c_in_p * c_out_p * mm_bytes + 4 * _STATS_ROWS * c_out_p * 4
    avail = max(vmem_budget - fixed, 1 << 20)
    # Per-row cost of the worst pass: 2x x tile (dbl-buf), up to 4x y/out tile
    # (dbl-buf in + dbl-buf out in the aliased pass), f32 matmul intermediate.
    per_row = 2 * c_in_p * mm_bytes + 4 * c_out_p * o_bytes + 4 * c_out_p
    per_row = int(per_row * 1.25) + 64          # Mosaic internal-scratch headroom
    t_max = max(sub_mult, min(4096, (avail // per_row) // sub_mult * sub_mult))
    m_r = _round_up(max(m, 1), sub_mult)
    if m_r <= t_max:
        return m_r
    n_tiles = _cdiv(m_r, t_max)
    return _round_up(_cdiv(m_r, n_tiles), sub_mult)   # balanced tiles, minimal pad


def _prefer_materialize(c_in_p, c_out_p, mm_bytes, o_bytes):
    """Roofline heuristic: materializing pre-BN y saves one matmul
    (2*Cin*Cout flop per row) but adds two HBM passes over y and removes one
    read of x (per row)."""
    ridge = 320.0 if mm_bytes <= 2 else 130.0       # flop/byte, conservative
    saved_mxu = 2.0 * c_in_p * c_out_p / ridge      # bytes-equivalent of saved matmul
    extra_hbm = 2.0 * c_out_p * o_bytes - c_in_p * mm_bytes
    return saved_mxu > extra_hbm


# --------------------------------------------------------------------------- #
# Kernels
# --------------------------------------------------------------------------- #
def _stats_kernel(x_ref, w_ref, stats_ref):
    """Pass 1 (recompute variant): accumulate per-channel sum / sumsq of
    y = x @ W into a per-split resident f32 block (row 0 = sum, row 1 = sumsq)."""
    i = pl.program_id(1)

    @pl.when(i == 0)
    def _init():
        stats_ref[...] = jnp.zeros_like(stats_ref)

    y = jnp.dot(x_ref[...], w_ref[...], preferred_element_type=jnp.float32)
    stats_ref[0:1, :] += jnp.sum(y, axis=0, keepdims=True)
    stats_ref[1:2, :] += jnp.sum(y * y, axis=0, keepdims=True)


def _conv_stats_kernel(x_ref, w_ref, y_ref, stats_ref):
    """Pass 1 (materialize variant): same stats accumulation, plus write the
    pre-BN y tile straight into the (later aliased) output buffer."""
    i = pl.program_id(1)

    @pl.when(i == 0)
    def _init():
        stats_ref[...] = jnp.zeros_like(stats_ref)

    y = jnp.dot(x_ref[...], w_ref[...], preferred_element_type=jnp.float32)
    y_ref[...] = y.astype(y_ref.dtype)
    stats_ref[0:1, :] += jnp.sum(y, axis=0, keepdims=True)
    stats_ref[1:2, :] += jnp.sum(y * y, axis=0, keepdims=True)


def _bn_apply_kernel(y_ref, bn_ref, o_ref):
    """Pass 2 (materialize variant): in-place y * scale + shift (pure FMA)."""
    y = y_ref[...].astype(jnp.float32)
    o_ref[...] = (y * bn_ref[0:1, :] + bn_ref[1:2, :]).astype(o_ref.dtype)


def _recompute_apply_kernel(x_ref, w_ref, bn_ref, o_ref):
    """Pass 2 (recompute variant): y = x @ W, then one FMA with the folded BN."""
    y = jnp.dot(x_ref[...], w_ref[...], preferred_element_type=jnp.float32)
    o_ref[...] = (y * bn_ref[0:1, :] + bn_ref[1:2, :]).astype(o_ref.dtype)


# --------------------------------------------------------------------------- #
# Wrapper
# --------------------------------------------------------------------------- #
@functools.partial(jax.jit,
                   static_argnames=("stride", "use_bf16_matmul", "materialize"))
def downsample_forward(x_nchw, conv_w, gamma, beta, stride=2,
                       use_bf16_matmul=False, materialize=None):
    """x_nchw: (N, C_in, H, W); conv_w: (C_out, C_in, 1, 1); gamma/beta: (C_out,)."""
    n, c_in, h, w = x_nchw.shape
    c_out = conv_w.shape[0]
    out_dtype = x_nchw.dtype

    # Strided 1x1 conv touches only every stride-th pixel: subsample, then go
    # channels-last so C sits on the lane dim.
    # TODO(synk): in a fused ResNet keep NHWC end-to-end (and emit NHWC output)
    # so this layout pass and the final transpose back to NCHW disappear.
    xs = x_nchw[:, :, ::stride, ::stride]
    ho, wo = xs.shape[2], xs.shape[3]
    m = n * ho * wo

    mm_dtype = jnp.bfloat16 if use_bf16_matmul else x_nchw.dtype
    mm_bytes = jnp.dtype(mm_dtype).itemsize
    o_bytes = jnp.dtype(out_dtype).itemsize

    c_out_p = _round_up(c_out, _LANE)                 # lane-dense output stores
    # Pad K (=C_in) to 128 only when big enough that the extra x traffic is
    # cheaper than an under-filled MXU contraction; tiny C_in stays un-padded.
    c_in_p = _round_up(c_in, _LANE) if c_in >= 64 else c_in

    sub_mult = _SUBLANE * max(1, 4 // min(mm_bytes, o_bytes))  # packed-sublane mult
    vmem_limit = _vmem_limit_bytes()
    tile_m = _pick_tile_m(m, c_in_p, c_out_p, mm_bytes, o_bytes, vmem_limit, sub_mult)

    n_tiles = _cdiv(m, tile_m)
    n_split = 2 if n_tiles >= 2 else 1        # per-core partial stats (v7x/megacore)
    n_tiles = _round_up(n_tiles, n_split)
    tiles_per_split = n_tiles // n_split
    m_p = n_tiles * tile_m

    if materialize is None:
        materialize = _prefer_materialize(c_in_p, c_out_p, mm_bytes, o_bytes)

    # ---- operand layout (producer pass; allow_input_fusion pulls it in) ----
    x_mat = jnp.transpose(xs, (0, 2, 3, 1)).reshape(m, c_in).astype(mm_dtype)
    if m_p != m or c_in_p != c_in:
        # Zero rows/cols contribute nothing to sum/sumsq; divisor is the real m.
        x_mat = jnp.pad(x_mat, ((0, m_p - m), (0, c_in_p - c_in)))

    w_mat = conv_w.reshape(c_out, c_in).T.astype(mm_dtype)    # (C_in, C_out)
    if c_in_p != c_in or c_out_p != c_out:
        w_mat = jnp.pad(w_mat, ((0, c_in_p - c_in), (0, c_out_p - c_out)))

    tps = tiles_per_split
    x_spec_p1 = pl.BlockSpec((tile_m, c_in_p), lambda c, i: (c * tps + i, 0))
    w_spec_p1 = pl.BlockSpec((c_in_p, c_out_p), lambda c, i: (0, 0))
    y_spec_p1 = pl.BlockSpec((tile_m, c_out_p), lambda c, i: (c * tps + i, 0))
    stats_spec = pl.BlockSpec((_STATS_ROWS, c_out_p), lambda c, i: (c, 0))
    stats_shape = jax.ShapeDtypeStruct((n_split * _STATS_ROWS, c_out_p), jnp.float32)

    p1_params = pltpu.CompilerParams(
        dimension_semantics=("parallel", "arbitrary"),
        vmem_limit_bytes=vmem_limit,
        allow_input_fusion=[True, False],
    )

    # ---- Pass 1: global BN statistics (accumulator over inner M axis) ------ #
    if materialize:
        y_pre, stats = pl.pallas_call(
            _conv_stats_kernel,
            out_shape=(jax.ShapeDtypeStruct((m_p, c_out_p), out_dtype), stats_shape),
            grid_spec=pltpu.PrefetchScalarGridSpec(
                num_scalar_prefetch=0,
                grid=(n_split, tiles_per_split),
                in_specs=[x_spec_p1, w_spec_p1],
                out_specs=[y_spec_p1, stats_spec],
            ),
            compiler_params=p1_params,
        )(x_mat, w_mat)
    else:
        y_pre = None
        stats = pl.pallas_call(
            _stats_kernel,
            out_shape=stats_shape,
            grid_spec=pltpu.PrefetchScalarGridSpec(
                num_scalar_prefetch=0,
                grid=(n_split, tiles_per_split),
                in_specs=[x_spec_p1, w_spec_p1],
                out_specs=stats_spec,
            ),
            compiler_params=p1_params,
        )(x_mat, w_mat)

    # ---- Combine per-core partials + fold gamma/beta (tiny XLA op) --------- #
    stats = stats.reshape(n_split, _STATS_ROWS, c_out_p)
    tot = jnp.sum(stats[:, 0, :], axis=0)
    tot_sq = jnp.sum(stats[:, 1, :], axis=0)
    inv_m = jnp.float32(1.0 / m)                   # divide by REAL row count
    mean = tot * inv_m
    # E[y^2] - E[y]^2 in f32; fine at these tolerances (switch to a
    # mean-shifted accumulation if they ever tighten).
    var = tot_sq * inv_m - mean * mean
    inv_std = jax.lax.rsqrt(var + jnp.float32(BN_EPS))
    gamma_p = jnp.pad(gamma.astype(jnp.float32), (0, c_out_p - c_out))
    beta_p = jnp.pad(beta.astype(jnp.float32), (0, c_out_p - c_out))
    scale = gamma_p * inv_std          # padded lanes: gamma=0 -> scale=0, shift=0
    shift = beta_p - mean * scale
    bn = jnp.stack([scale, shift], axis=0)         # (2, C_out_p) f32

    # ---- Pass 2: apply folded BN; independent M tiles -> "parallel" -------- #
    bn_spec = pl.BlockSpec((2, c_out_p), lambda i: (0, 0))
    o_spec = pl.BlockSpec((tile_m, c_out_p), lambda i: (i, 0))

    if materialize:
        out_mat = pl.pallas_call(
            _bn_apply_kernel,
            out_shape=jax.ShapeDtypeStruct((m_p, c_out_p), out_dtype),
            grid_spec=pltpu.PrefetchScalarGridSpec(
                num_scalar_prefetch=0,
                grid=(n_tiles,),
                in_specs=[pl.BlockSpec((tile_m, c_out_p), lambda i: (i, 0)), bn_spec],
                out_specs=o_spec,
            ),
            input_output_aliases={0: 0},           # in-place FMA over pre-BN y
            compiler_params=pltpu.CompilerParams(
                dimension_semantics=("parallel",),
                vmem_limit_bytes=vmem_limit,
            ),
        )(y_pre, bn)
    else:
        out_mat = pl.pallas_call(
            _recompute_apply_kernel,
            out_shape=jax.ShapeDtypeStruct((m_p, c_out_p), out_dtype),
            grid_spec=pltpu.PrefetchScalarGridSpec(
                num_scalar_prefetch=0,
                grid=(n_tiles,),
                in_specs=[pl.BlockSpec((tile_m, c_in_p), lambda i: (i, 0)),
                          pl.BlockSpec((c_in_p, c_out_p), lambda i: (0, 0)),
                          bn_spec],
                out_specs=o_spec,
            ),
            compiler_params=pltpu.CompilerParams(
                dimension_semantics=("parallel",),
                vmem_limit_bytes=vmem_limit,
                allow_input_fusion=[True, False, False],
            ),
        )(x_mat, w_mat, bn)

    out = out_mat[:m, :c_out].reshape(n, ho, wo, c_out)
    return jnp.transpose(out, (0, 3, 1, 2))


if __name__ == "__main__":
    key = jax.random.PRNGKey(0)
    k_x, k_w, k_g, k_b = jax.random.split(key, 4)

    N, C_IN, H, W = 2, 4, 16, 16
    C_OUT, STRIDE = 8, 2

    x = jax.random.normal(k_x, (N, C_IN, H, W), dtype=jnp.float32)
    conv_w = jax.random.normal(k_w, (C_OUT, C_IN, 1, 1), dtype=jnp.float32) * 0.1
    gamma = jax.random.normal(k_g, (C_OUT,), dtype=jnp.float32) * 0.1 + 1.0
    beta = jax.random.normal(k_b, (C_OUT,), dtype=jnp.float32) * 0.1

    # Pure-JAX reference: 1x1 strided conv + training-mode BatchNorm2d forward.
    xs = x[:, :, ::STRIDE, ::STRIDE]
    y_ref = jnp.einsum("nchw,oc->nohw", xs, conv_w.reshape(C_OUT, C_IN))
    mu = y_ref.mean(axis=(0, 2, 3), keepdims=True)
    var = ((y_ref - mu) ** 2).mean(axis=(0, 2, 3), keepdims=True)
    ref = (y_ref - mu) / jnp.sqrt(var + BN_EPS) * gamma.reshape(1, -1, 1, 1) \
          + beta.reshape(1, -1, 1, 1)

    out_auto = downsample_forward(x, conv_w, gamma, beta, stride=STRIDE)
    out_rec = downsample_forward(x, conv_w, gamma, beta, stride=STRIDE,
                                 materialize=False)
    out_fma = downsample_forward(x, conv_w, gamma, beta, stride=STRIDE,
                                 materialize=True)
    jax.block_until_ready((out_auto, out_rec, out_fma))

    for o in (out_auto, out_rec, out_fma):
        assert o.shape == (N, C_OUT, H // STRIDE, W // STRIDE)
        assert jnp.allclose(o, ref, atol=1e-4, rtol=1e-4)

    print("KERNEL_OK")
</pallas_src>

<mosaic_0001>
module attributes {stable_mosaic.version = 11 : i64} {
  func.func @_stats_kernel(%arg0: i32, %arg1: i32, %arg2: memref<128x4xf32, #tpu.memory_space<vmem>>, %arg3: memref<4x128xf32, #tpu.memory_space<vmem>>, %arg4: memref<8x128xf32, #tpu.memory_space<vmem>>) attributes {dimension_semantics = [#tpu.dimension_semantics<parallel>, #tpu.dimension_semantics<arbitrary>], iteration_bounds = array<i64: 1, 1>, scalar_prefetch = 0 : i64, scratch_operands = 0 : i64, tpu.core_type = #tpu.core_type<tc>, window_params = [{transform_indices = @transform_0, window_bounds = array<i64: 128, 4>}, {pipeline_mode = #tpu.pipeline_mode<synchronous>, transform_indices = @transform_1, window_bounds = array<i64: 4, 128>}, {transform_indices = @transform_2, window_bounds = array<i64: 8, 128>}]} {
    %c0_i32 = arith.constant 0 : i32
    %0 = arith.cmpi eq, %arg1, %c0_i32 : i32
    %1 = arith.extui %0 : i1 to i32
    %c0_i32_0 = arith.constant 0 : i32
    %2 = arith.cmpi ne, %1, %c0_i32_0 : i32
    scf.if %2 {
      %cst_13 = arith.constant 0.000000e+00 : f32
      %17 = vector.broadcast %cst_13 : f32 to vector<8x128xf32>
      %c0_14 = arith.constant 0 : index
      %c0_15 = arith.constant 0 : index
      %18 = vector.load %arg4[%c0_14, %c0_15] : memref<8x128xf32, #tpu.memory_space<vmem>>, vector<8x128xf32>
      tpu.vector_store %arg4[%c0_14, %c0_15], %17 {strides = array<i32>} : memref<8x128xf32, #tpu.memory_space<vmem>>, vector<8x128xf32>,
    } else {
    }
    %c0 = arith.constant 0 : index
    %c0_1 = arith.constant 0 : index
    %3 = vector.load %arg2[%c0, %c0_1] : memref<128x4xf32, #tpu.memory_space<vmem>>, vector<128x4xf32>
    %c0_2 = arith.constant 0 : index
    %c0_3 = arith.constant 0 : index
    %4 = vector.load %arg3[%c0_2, %c0_3] : memref<4x128xf32, #tpu.memory_space<vmem>>, vector<4x128xf32>
    %cst = arith.constant dense<0.000000e+00> : vector<128x128xf32>
    %5 = tpu.matmul %3, %4, %cst {dimension_numbers = #tpu.dot_dimension_numbers<[1], [0], [0], [1], [0, 0, 1, 1], [], []>} : vector<128x4xf32>, vector<4x128xf32>, vector<128x128xf32> -> vector<128x128xf32>
    %c0_4 = arith.constant 0 : index
    %c0_5 = arith.constant 0 : index
    %6 = vector.load %arg4[%c0_4, %c0_5] : memref<8x128xf32, #tpu.memory_space<vmem>>, vector<1x128xf32>
    %cst_6 = arith.constant dense<0.000000e+00> : vector<128xf32>
    %7 = vector.multi_reduction <add>, %5, %cst_6 [0] : vector<128x128xf32> to vector<128xf32>
    %8 = vector.shape_cast %7 : vector<128xf32> to vector<1x128xf32>
    %9 = arith.addf %6, %8 : vector<1x128xf32>
    %c0_7 = arith.constant 0 : index
    %c0_8 = arith.constant 0 : index
    %10 = vector.load %arg4[%c0_7, %c0_8] : memref<8x128xf32, #tpu.memory_space<vmem>>, vector<1x128xf32>
    tpu.vector_store %arg4[%c0_7, %c0_8], %9 {strides = array<i32>} : memref<8x128xf32, #tpu.memory_space<vmem>>, vector<1x128xf32>,
    %c1 = arith.constant 1 : index
    %c0_9 = arith.constant 0 : index
    %11 = vector.load %arg4[%c1, %c0_9] : memref<8x128xf32, #tpu.memory_space<vmem>>, vector<1x128xf32>
    %12 = arith.mulf %5, %5 : vector<128x128xf32>
    %cst_10 = arith.constant dense<0.000000e+00> : vector<128xf32>
    %13 = vector.multi_reduction <add>, %12, %cst_10 [0] : vector<128x128xf32> to vector<128xf32>
    %14 = vector.shape_cast %13 : vector<128xf32> to vector<1x128xf32>
    %15 = arith.addf %11, %14 : vector<1x128xf32>
    %c1_11 = arith.constant 1 : index
    %c0_12 = arith.constant 0 : index
    %16 = vector.load %arg4[%c1_11, %c0_12] : memref<8x128xf32, #tpu.memory_space<vmem>>, vector<1x128xf32>
    tpu.vector_store %arg4[%c1_11, %c0_12], %15 {strides = array<i32>} : memref<8x128xf32, #tpu.memory_space<vmem>>, vector<1x128xf32>,
    return
  }
  func.func @transform_0(%arg0: i32, %arg1: i32) -> (i32, i32) {
    %c1_i32 = arith.constant 1 : i32
    %0 = arith.muli %arg0, %c1_i32 : i32
    %1 = arith.addi %0, %arg1 : i32
    %c0_i32 = arith.constant 0 : i32
    %c0_i32_0 = arith.constant 0 : i32
    return %1, %c0_i32 : i32, i32
  }
  func.func @transform_1(%arg0: i32, %arg1: i32) -> (i32, i32) {
    %c0_i32 = arith.constant 0 : i32
    %c0_i32_0 = arith.constant 0 : i32
    %c0_i32_1 = arith.constant 0 : i32
    return %c0_i32, %c0_i32_0 : i32, i32
  }
  func.func @transform_2(%arg0: i32, %arg1: i32) -> (i32, i32) {
    %c0_i32 = arith.constant 0 : i32
    %c0_i32_0 = arith.constant 0 : i32
    return %arg0, %c0_i32 : i32, i32
  }
}

module attributes {stable_mosaic.version = 11 : i64} {
  func.func @_recompute_apply_kernel(%arg0: i32, %arg1: memref<128x4xf32, #tpu.memory_space<vmem>>, %arg2: memref<4x128xf32, #tpu.memory_space<vmem>>, %arg3: memref<2x128xf32, #tpu.memory_space<vmem>>, %arg4: memref<128x128xf32, #tpu.memory_space<vmem>>) attributes {dimension_semantics = [#tpu.dimension_semantics<parallel>], iteration_bounds = array<i64: 1>, scalar_prefetch = 0 : i64, scratch_operands = 0 : i64, tpu.core_type = #tpu.core_type<tc>, window_params = [{transform_indices = @transform_0, window_bounds = array<i64: 128, 4>}, {pipeline_mode = #tpu.pipeline_mode<synchronous>, transform_indices = @transform_1, window_bounds = array<i64: 4, 128>}, {pipeline_mode = #tpu.pipeline_mode<synchronous>, transform_indices = @transform_2, window_bounds = array<i64: 2, 128>}, {transform_indices = @transform_3, window_bounds = array<i64: 128, 128>}]} {
    %c0 = arith.constant 0 : index
    %c0_0 = arith.constant 0 : index
    %0 = vector.load %arg1[%c0, %c0_0] : memref<128x4xf32, #tpu.memory_space<vmem>>, vector<128x4xf32>
    %c0_1 = arith.constant 0 : index
    %c0_2 = arith.constant 0 : index
    %1 = vector.load %arg2[%c0_1, %c0_2] : memref<4x128xf32, #tpu.memory_space<vmem>>, vector<4x128xf32>
    %cst = arith.constant dense<0.000000e+00> : vector<128x128xf32>
    %2 = tpu.matmul %0, %1, %cst {dimension_numbers = #tpu.dot_dimension_numbers<[1], [0], [0], [1], [0, 0, 1, 1], [], []>} : vector<128x4xf32>, vector<4x128xf32>, vector<128x128xf32> -> vector<128x128xf32>
    %c0_3 = arith.constant 0 : index
    %c0_4 = arith.constant 0 : index
    %3 = vector.load %arg3[%c0_3, %c0_4] : memref<2x128xf32, #tpu.memory_space<vmem>>, vector<1x128xf32>
    %4 = vector.broadcast %3 : vector<1x128xf32> to vector<128x128xf32>
    %5 = arith.mulf %2, %4 : vector<128x128xf32>
    %c1 = arith.constant 1 : index
    %c0_5 = arith.constant 0 : index
    %6 = vector.load %arg3[%c1, %c0_5] : memref<2x128xf32, #tpu.memory_space<vmem>>, vector<1x128xf32>
    %7 = vector.broadcast %6 : vector<1x128xf32> to vector<128x128xf32>
    %8 = arith.addf %5, %7 : vector<128x128xf32>
    %c0_6 = arith.constant 0 : index
    %c0_7 = arith.constant 0 : index
    %9 = vector.load %arg4[%c0_6, %c0_7] : memref<128x128xf32, #tpu.memory_space<vmem>>, vector<128x128xf32>
    tpu.vector_store %arg4[%c0_6, %c0_7], %8 {strides = array<i32>} : memref<128x128xf32, #tpu.memory_space<vmem>>, vector<128x128xf32>,
    return
  }
  func.func @transform_0(%arg0: i32) -> (i32, i32) {
    %c0_i32 = arith.constant 0 : i32
    %c0_i32_0 = arith.constant 0 : i32
    return %arg0, %c0_i32 : i32, i32
  }
  func.func @transform_1(%arg0: i32) -> (i32, i32) {
    %c0_i32 = arith.constant 0 : i32
    %c0_i32_0 = arith.constant 0 : i32
    %c0_i32_1 = arith.constant 0 : i32
    return %c0_i32, %c0_i32_0 : i32, i32
  }
  func.func @transform_2(%arg0: i32) -> (i32, i32) {
    %c0_i32 = arith.constant 0 : i32
    %c0_i32_0 = arith.constant 0 : i32
    %c0_i32_1 = arith.constant 0 : i32
    return %c0_i32, %c0_i32_0 : i32, i32
  }
  func.func @transform_3(%arg0: i32) -> (i32, i32) {
    %c0_i32 = arith.constant 0 : i32
    %c0_i32_0 = arith.constant 0 : i32
    return %arg0, %c0_i32 : i32, i32
  }
}

</mosaic_0001>

<bundles_post_ra>
// kernel: downsample_forward.2
= control target key start
LH: loop header
LB: loop body
LE: loop exit
PB: predicated region body
PF: predicated region fallthrough
CT: control target
= control target key end

     0   :  { %vm104_vm0 = vcmask 1043456   ;;  %vm55_vm1 = vcmask 31744   ;;  %v390_v17 = vmov 0.0   ;;  %s488_s1 = inlined_call_operand.vmem [shape: f32[4,128], index: 1, kind: input, shape index: {}]   ;;  %s489_s0 = inlined_call_operand.vmem [shape: f32[128,4], index: 0, kind: input, shape index: {}]   ;;  %s490_s2 = inlined_call_operand.vmem [shape: f32[8,128], index: 2, kind: output, shape index: {}]  }
   0x1   :  { %v54_v0 = vld [vmem:[%s488_s1] sm:$0xf]  ;;  %v39_v2 = vld [vmem:[%s489_s0 + $0x8] sm:$0xff]  ;;  %v40_v3 = vld [vmem:[%s489_s0 + $0x10] sm:$0xff]  ;;  %37 = vst [vmem:[%s490_s2] sm:$0xff] %v390_v17 }
   0x2   :  { %v38_v1 = vld [vmem:[%s489_s0] sm:$0xff]  ;;  %361 = vmatprep.subr.msk.mxu0 %vm104_vm0, %v54_v0  ;;  %387 = vmatprep.subr.msk.mxu1 %vm104_vm0, %v54_v0  ;;  %v47_v5 = vld [vmem:[%s489_s0 + $0x48] sm:$0xff]  ;;  %v48_v6 = vld [vmem:[%s489_s0 + $0x50] sm:$0xff] }
   0x3   :  { %363 = vmatprep.mubr.msk.f32.mxu0 %vm55_vm1, %v38_v1  ;;  %362 = vmatpush3.msk.msra.mxu0 %vm104_vm0, %v54_v0  ;;  %v46_v4 = vld [vmem:[%s489_s0 + $0x40] sm:$0xff]  ;;  %v41_v7 = vld [vmem:[%s489_s0 + $0x18] sm:$0xff]  ;;  %v43_v11 = vld [vmem:[%s489_s0 + $0x28] sm:$0xff] }
   0x4   :  { %364 = vmatmul.mubr.msk.f32.vlgmr.msra.gmra.mxu0 %vm55_vm1, %v39_v2  ;;  %388 = vmatpush3.msk.msra.mxu1 %vm104_vm0, %v54_v0  ;;  %v42_v8 = vld [vmem:[%s489_s0 + $0x20] sm:$0xff]  ;;  %v49_v9 = vld [vmem:[%s489_s0 + $0x58] sm:$0xff]  ;;  %v44_v12 = vld [vmem:[%s489_s0 + $0x30] sm:$0xff] }
   0x5   :  { %366 = vmatprep.mubr.msk.f32.mxu0 %vm55_vm1, %v40_v3  ;;  %375 = vmatprep.mubr.msk.f32.mxu1 %vm55_vm1, %v46_v4  ;;  %v50_v10 = vld [vmem:[%s489_s0 + $0x60] sm:$0xff]  ;;  %v51_v13 = vld [vmem:[%s489_s0 + $0x68] sm:$0xff]  ;;  %v52_v14 = vld [vmem:[%s489_s0 + $0x70] sm:$0xff] }
   0x6   :  { %376 = vmatmul.mubr.msk.f32.vlgmr.msra.gmra.mxu1 %vm55_vm1, %v47_v5  ;;  %v45_v15 = vld [vmem:[%s489_s0 + $0x38] sm:$0xff] }
   0x7   :  { %378 = vmatprep.mubr.msk.f32.mxu1 %vm55_vm1, %v48_v6  ;;  %v53_v16 = vld [vmem:[%s489_s0 + $0x78] sm:$0xff] }
   0x8   :  { %367 = vmatmul.mubr.msk.f32.gmra.mxu0 %vm55_vm1, %v41_v7 }
   0x9   :  { %369 = vmatprep.mubr.msk.f32.mxu0 %vm55_vm1, %v42_v8 }
   0xa   :  { %379 = vmatmul.mubr.msk.f32.gmra.mxu1 %vm55_vm1, %v49_v9 }
   0xb   :  { %381 = vmatprep.mubr.msk.f32.mxu1 %vm55_vm1, %v50_v10 }
   0xc   :  { %370 = vmatmul.mubr.msk.f32.gmra.mxu0 %vm55_vm1, %v43_v11 }
   0xd   :  { %372 = vmatprep.mubr.msk.f32.mxu0 %vm55_vm1, %v44_v12 }
   0xe   :  { %382 = vmatmul.mubr.msk.f32.gmra.mxu1 %vm55_vm1, %v51_v13 }
   0xf   :  { %384 = vmatprep.mubr.msk.f32.mxu1 %vm55_vm1, %v52_v14 }
  0x10   :  { %373 = vmatmul.mubr.msk.f32.gmra.mxu0 %vm55_vm1, %v45_v15 }
  0x12   :  { %385 = vmatmul.mubr.msk.f32.gmra.mxu1 %vm55_vm1, %v53_v16 }
  0xc4   :  { %v365_v18 = vpop.f32.mrf.mxu0 }
  0xc5   :  { %v279_v24 = vmul.f32 %v365_v18, %v365_v18 }
  0xc6   :  { %v174_v19 = vpop.f32.mrf.mxu0  ;;  %v377_v20 = vpop.f32.mrf.mxu1 }
  0xc7   :  { %v278_v21 = vmul.f32 %v174_v19, %v174_v19  ;;  %v254_v25 = vadd.f32 %v365_v18, %v174_v19  ;;  %v287_v56 = vmul.f32 %v377_v20, %v377_v20 }
  0xc8   :  { %v368_v22 = vpop.f32.mrf.mxu0  ;;  %v214_v23 = vpop.f32.mrf.mxu1 }
  0xc9   :  { %v294_v27 = vadd.f32 %v279_v24, %v278_v21  ;;  %v281_v32 = vmul.f32 %v368_v22, %v368_v22  ;;  %v286_v54 = vmul.f32 %v214_v23, %v214_v23 }
  0xca   :  { %v184_v26 = vpop.f32.mrf.mxu0  ;;  %v380_v31 = vpop.f32.mrf.mxu1 }
  0xcb   :  { %v255_v28 = vadd.f32 %v254_v25, %v184_v26  ;;  %v280_v29 = vmul.f32 %v184_v26, %v184_v26  ;;  %v289_v63 = vmul.f32 %v380_v31, %v380_v31  ;;  %v253_v25 = vld [vmem:[%s490_s2] sm:$0x1] }
  0xcc   :  { %v371_v30 = vpop.f32.mrf.mxu0  ;;  %v224_v40 = vpop.f32.mrf.mxu1 }
  0xcd   :  { %v295_v33 = vadd.f32 %v294_v27, %v280_v29  ;;  %v256_v34 = vadd.f32 %v368_v22, %v255_v28  ;;  %v283_v41 = vmul.f32 %v371_v30, %v371_v30  ;;  %v288_v60 = vmul.f32 %v224_v40, %v224_v40  ;;  %v277_v28 = vld [vmem:[%s490_s2 + $0x1] sm:$0x1] }
  0xce   :  { %v194_v35 = vpop.f32.mrf.mxu0  ;;  %v383_v48 = vpop.f32.mrf.mxu1 }
  0xcf   :  { %v257_v36 = vadd.f32 %v256_v34, %v194_v35  ;;  %v282_v37 = vmul.f32 %v194_v35, %v194_v35  ;;  %v296_v38 = vadd.f32 %v295_v33, %v281_v32  ;;  %v291_v6 = vmul.f32 %v383_v48, %v383_v48 }
  0xd0   :  { %v374_v39 = vpop.f32.mrf.mxu0  ;;  %v234_v55 = vpop.f32.mrf.mxu1 }
  0xd1   :  { %v297_v42 = vadd.f32 %v296_v38, %v282_v37  ;;  %v258_v43 = vadd.f32 %v371_v30, %v257_v36  ;;  %v285_v49 = vmul.f32 %v374_v39, %v374_v39  ;;  %v290_v3 = vmul.f32 %v234_v55, %v234_v55 }
  0xd2   :  { %v204_v44 = vpop.f32.mrf.mxu0  ;;  %v386_v62 = vpop.f32.mrf.mxu1 }
  0xd3   :  { %v259_v45 = vadd.f32 %v258_v43, %v204_v44  ;;  %v284_v46 = vmul.f32 %v204_v44, %v204_v44  ;;  %v298_v47 = vadd.f32 %v297_v42, %v283_v41  ;;  %v293_v12 = vmul.f32 %v386_v62, %v386_v62 }
  0xd4   :  { %v244_v5 = vpop.f32.mrf.mxu1 }
  0xd5   :  { %v260_v50 = vadd.f32 %v374_v39, %v259_v45  ;;  %v299_v51 = vadd.f32 %v298_v47, %v284_v46  ;;  %v292_v10 = vmul.f32 %v244_v5, %v244_v5 }
  0xd7   :  { %v300_v52 = vadd.f32 %v299_v51, %v285_v49  ;;  %v261_v53 = vadd.f32 %v260_v50, %v214_v23 }
  0xd9   :  { %v301_v57 = vadd.f32 %v300_v52, %v286_v54  ;;  %v262_v58 = vadd.f32 %v377_v20, %v261_v53 }
  0xdb   :  { %v263_v59 = vadd.f32 %v262_v58, %v224_v40  ;;  %v302_v61 = vadd.f32 %v301_v57, %v287_v56 }
  0xdd   :  { %v303_v0 = vadd.f32 %v302_v61, %v288_v60  ;;  %v264_v1 = vadd.f32 %v380_v31, %v263_v59 }
  0xdf   :  { %v265_v2 = vadd.f32 %v264_v1, %v234_v55  ;;  %v304_v4 = vadd.f32 %v303_v0, %v289_v63 }
  0xe1   :  { %v305_v7 = vadd.f32 %v304_v4, %v290_v3  ;;  %v266_v8 = vadd.f32 %v383_v48, %v265_v2 }
  0xe3   :  { %v267_v9 = vadd.f32 %v266_v8, %v244_v5  ;;  %v306_v11 = vadd.f32 %v305_v7, %v291_v6 }
  0xe5   :  { %v268_v13 = vadd.f32 %v386_v62, %v267_v9  ;;  %v307_v14 = vadd.f32 %v306_v11, %v292_v10 }
  0xe7   :  { %v269_v15 = vrot.slane %v268_v13, 4  ;;  %v308_v16 = vadd.f32 %v307_v14, %v293_v12 }
  0xe9   :  { %v270_v17 = vadd.f32 %v269_v15, %v268_v13  ;;  %v309_v18 = vrot.slane %v308_v16, 4 }
  0xeb   :  { %v271_v19 = vrot.slane %v270_v17, 2  ;;  %v310_v20 = vadd.f32 %v309_v18, %v308_v16 }
  0xed   :  { %v272_v21 = vadd.f32 %v271_v19, %v270_v17  ;;  %v311_v22 = vrot.slane %v310_v20, 2 }
  0xef   :  { %v273_v23 = vrot.slane %v272_v21, 1  ;;  %v312_v24 = vadd.f32 %v311_v22, %v310_v20 }
  0xf1   :  { %v274_v26 = vadd.f32 %v273_v23, %v272_v21  ;;  %v313_v27 = vrot.slane %v312_v24, 1 }
  0xf3   :  { %v275_v29 = vadd.f32 %v274_v26, %v253_v25  ;;  %v314_v30 = vadd.f32 %v313_v27, %v312_v24 }
  0xf5   :  { %276 = vst [vmem:[%s490_s2] sm:$0x1] %v275_v29  ;;  %v315_v31 = vadd.f32 %v314_v30, %v277_v28 }
  0xf7   :  { %316 = vst [vmem:[%s490_s2 + $0x1] sm:$0x1] %v315_v31 }

// kernel: downsample_forward.3
= control target key start
LH: loop header
LB: loop body
LE: loop exit
PB: predicated region body
PF: predicated region fallthrough
CT: control target
= control target key end

     0   :  { %vm80_vm0 = vcmask 1043456   ;;  %vm31_vm1 = vcmask 31744   ;;  %s496_s1 = inlined_call_operand.vmem [shape: f32[4,128], index: 1, kind: input, shape index: {}]   ;;  %s497_s0 = inlined_call_operand.vmem [shape: f32[128,4], index: 0, kind: input, shape index: {}]   ;;  %s498_s2 = inlined_call_operand.vmem [shape: f32[2,128], index: 2, kind: input, shape index: {}]   ;;  %s499_s3 = inlined_call_operand.vmem [shape: f32[128,128], index: 3, kind: output, shape index: {}]  }
   0x1   :  { %v30_v0 = vld [vmem:[%s496_s1] sm:$0xf]  ;;  %v15_v3 = vld [vmem:[%s497_s0 + $0x8] sm:$0xff]  ;;  %v16_v5 = vld [vmem:[%s497_s0 + $0x10] sm:$0xff] }
   0x2   :  { %v14_v1 = vld [vmem:[%s497_s0] sm:$0xff]  ;;  %327 = vmatprep.subr.msk.mxu0 %vm80_vm0, %v30_v0  ;;  %353 = vmatprep.subr.msk.mxu1 %vm80_vm0, %v30_v0  ;;  %v23_v4 = vld [vmem:[%s497_s0 + $0x48] sm:$0xff]  ;;  %v24_v6 = vld [vmem:[%s497_s0 + $0x50] sm:$0xff] }
   0x3   :  { %v22_v2 = vld [vmem:[%s497_s0 + $0x40] sm:$0xff]  ;;  %328 = vmatpush3.msk.msra.mxu0 %vm80_vm0, %v30_v0  ;;  %354 = vmatpush3.msk.msra.mxu1 %vm80_vm0, %v30_v0  ;;  %v17_v7 = vld [vmem:[%s497_s0 + $0x18] sm:$0xff]  ;;  %v19_v11 = vld [vmem:[%s497_s0 + $0x28] sm:$0xff] }
   0x4   :  { %329 = vmatprep.mubr.msk.f32.mxu0 %vm31_vm1, %v14_v1  ;;  %341 = vmatprep.mubr.msk.f32.mxu1 %vm31_vm1, %v22_v2  ;;  %v25_v8 = vld [vmem:[%s497_s0 + $0x58] sm:$0xff]  ;;  %v18_v9 = vld [vmem:[%s497_s0 + $0x20] sm:$0xff]  ;;  %v27_v12 = vld [vmem:[%s497_s0 + $0x68] sm:$0xff] }
   0x5   :  { %330 = vmatmul.mubr.msk.f32.vlgmr.msra.gmra.mxu0 %vm31_vm1, %v15_v3  ;;  %342 = vmatmul.mubr.msk.f32.vlgmr.msra.gmra.mxu1 %vm31_vm1, %v23_v4  ;;  %v26_v10 = vld [vmem:[%s497_s0 + $0x60] sm:$0xff]  ;;  %v20_v13 = vld [vmem:[%s497_s0 + $0x30] sm:$0xff]  ;;  %v21_v15 = vld [vmem:[%s497_s0 + $0x38] sm:$0xff] }
   0x6   :  { %332 = vmatprep.mubr.msk.f32.mxu0 %vm31_vm1, %v16_v5  ;;  %344 = vmatprep.mubr.msk.f32.mxu1 %vm31_vm1, %v24_v6  ;;  %v28_v14 = vld [vmem:[%s497_s0 + $0x70] sm:$0xff]  ;;  %v29_v16 = vld [vmem:[%s497_s0 + $0x78] sm:$0xff]  ;;  %v308_v17 = vld [vmem:[%s498_s2] ss:$0 sm:$0xff] }
   0x7   :  { %v309_v19 = vld [vmem:[%s498_s2 + $0x1] ss:$0 sm:$0xff] }
   0x9   :  { %333 = vmatmul.mubr.msk.f32.gmra.mxu0 %vm31_vm1, %v17_v7  ;;  %345 = vmatmul.mubr.msk.f32.gmra.mxu1 %vm31_vm1, %v25_v8 }
   0xa   :  { %335 = vmatprep.mubr.msk.f32.mxu0 %vm31_vm1, %v18_v9  ;;  %347 = vmatprep.mubr.msk.f32.mxu1 %vm31_vm1, %v26_v10 }
   0xd   :  { %336 = vmatmul.mubr.msk.f32.gmra.mxu0 %vm31_vm1, %v19_v11  ;;  %348 = vmatmul.mubr.msk.f32.gmra.mxu1 %vm31_vm1, %v27_v12 }
   0xe   :  { %338 = vmatprep.mubr.msk.f32.mxu0 %vm31_vm1, %v20_v13  ;;  %350 = vmatprep.mubr.msk.f32.mxu1 %vm31_vm1, %v28_v14 }
  0x11   :  { %339 = vmatmul.mubr.msk.f32.gmra.mxu0 %vm31_vm1, %v21_v15  ;;  %351 = vmatmul.mubr.msk.f32.gmra.mxu1 %vm31_vm1, %v29_v16 }
  0xc5   :  { %v331_v18 = vpop.f32.mrf.mxu0  ;;  %v343_v20 = vpop.f32.mrf.mxu1 }
  0xc6   :  { %v235_v21 = vmul.f32 %v331_v18, %v308_v17  ;;  %v243_v22 = vmul.f32 %v343_v20, %v308_v17 }
  0xc7   :  { %v150_v23 = vpop.f32.mrf.mxu0  ;;  %v190_v24 = vpop.f32.mrf.mxu1 }
  0xc8   :  { %v256_v25 = vadd.f32 %v309_v19, %v235_v21  ;;  %v264_v26 = vadd.f32 %v309_v19, %v243_v22  ;;  %v234_v27 = vmul.f32 %v308_v17, %v150_v23  ;;  %v242_v28 = vmul.f32 %v308_v17, %v190_v24 }
  0xc9   :  { %v334_v29 = vpop.f32.mrf.mxu0  ;;  %v346_v30 = vpop.f32.mrf.mxu1 }
  0xca   :  { %272 = vst [vmem:[%s499_s3 + $0x8] sm:$0xff] %v256_v25  ;;  %280 = vst [vmem:[%s499_s3 + $0x48] sm:$0xff] %v264_v26  ;;  %v255_v31 = vadd.f32 %v309_v19, %v234_v27  ;;  %v263_v32 = vadd.f32 %v309_v19, %v242_v28  ;;  %v237_v33 = vmul.f32 %v334_v29, %v308_v17 }
  0xcb   :  { %v245_v34 = vmul.f32 %v346_v30, %v308_v17  ;;  %v160_v35 = vpop.f32.mrf.mxu0  ;;  %v200_v36 = vpop.f32.mrf.mxu1 }
  0xcc   :  { %271 = vst [vmem:[%s499_s3] sm:$0xff] %v255_v31  ;;  %279 = vst [vmem:[%s499_s3 + $0x40] sm:$0xff] %v263_v32  ;;  %v258_v37 = vadd.f32 %v309_v19, %v237_v33  ;;  %v236_v39 = vmul.f32 %v308_v17, %v160_v35  ;;  %v244_v40 = vmul.f32 %v308_v17, %v200_v36 }
  0xcd   :  { %v266_v38 = vadd.f32 %v309_v19, %v245_v34  ;;  %v337_v41 = vpop.f32.mrf.mxu0  ;;  %v349_v42 = vpop.f32.mrf.mxu1 }
  0xce   :  { %274 = vst [vmem:[%s499_s3 + $0x18] sm:$0xff] %v258_v37  ;;  %v257_v43 = vadd.f32 %v309_v19, %v236_v39  ;;  %v265_v44 = vadd.f32 %v309_v19, %v244_v40  ;;  %v239_v45 = vmul.f32 %v337_v41, %v308_v17  ;;  %v247_v46 = vmul.f32 %v349_v42, %v308_v17 }
  0xcf   :  { %282 = vst [vmem:[%s499_s3 + $0x58] sm:$0xff] %v266_v38  ;;  %v170_v47 = vpop.f32.mrf.mxu0  ;;  %v210_v48 = vpop.f32.mrf.mxu1 }
  0xd0   :  { %273 = vst [vmem:[%s499_s3 + $0x10] sm:$0xff] %v257_v43  ;;  %281 = vst [vmem:[%s499_s3 + $0x50] sm:$0xff] %v265_v44  ;;  %v260_v49 = vadd.f32 %v309_v19, %v239_v45  ;;  %v268_v50 = vadd.f32 %v309_v19, %v247_v46  ;;  %v238_v51 = vmul.f32 %v308_v17, %v170_v47 }
  0xd1   :  { %v246_v52 = vmul.f32 %v308_v17, %v210_v48  ;;  %v340_v53 = vpop.f32.mrf.mxu0  ;;  %v352_v54 = vpop.f32.mrf.mxu1 }
  0xd2   :  { %276 = vst [vmem:[%s499_s3 + $0x28] sm:$0xff] %v260_v49  ;;  %284 = vst [vmem:[%s499_s3 + $0x68] sm:$0xff] %v268_v50  ;;  %v259_v55 = vadd.f32 %v309_v19, %v238_v51  ;;  %v241_v57 = vmul.f32 %v340_v53, %v308_v17  ;;  %v249_v58 = vmul.f32 %v352_v54, %v308_v17 }
  0xd3   :  { %v267_v56 = vadd.f32 %v309_v19, %v246_v52  ;;  %v180_v59 = vpop.f32.mrf.mxu0  ;;  %v220_v60 = vpop.f32.mrf.mxu1 }
  0xd4   :  { %275 = vst [vmem:[%s499_s3 + $0x20] sm:$0xff] %v259_v55  ;;  %v262_v61 = vadd.f32 %v309_v19, %v241_v57  ;;  %v270_v62 = vadd.f32 %v309_v19, %v249_v58  ;;  %v240_v63 = vmul.f32 %v308_v17, %v180_v59  ;;  %v248_v0 = vmul.f32 %v308_v17, %v220_v60 }
  0xd5   :  { %283 = vst [vmem:[%s499_s3 + $0x60] sm:$0xff] %v267_v56 }
  0xd6   :  { %278 = vst [vmem:[%s499_s3 + $0x38] sm:$0xff] %v262_v61  ;;  %286 = vst [vmem:[%s499_s3 + $0x78] sm:$0xff] %v270_v62  ;;  %v261_v1 = vadd.f32 %v309_v19, %v240_v63  ;;  %v269_v2 = vadd.f32 %v309_v19, %v248_v0 }
  0xd8   :  { %277 = vst [vmem:[%s499_s3 + $0x30] sm:$0xff] %v261_v1  ;;  %285 = vst [vmem:[%s499_s3 + $0x70] sm:$0xff] %v269_v2 }

</bundles_post_ra>
